<compile_context>
chip_gen: v7x
topology: tpu7x:2x2x1
jax: 0.10.0
libtpu: 0.0.40
codegen_flags: <defaults>
</compile_context>

<pallas_src>
import functools

import jax
import jax.numpy as jnp
from jax import lax
from jax.experimental import pallas as pl
from jax.experimental.pallas import tpu as pltpu

LANE = 128


def _round_up(x, m):
    return ((x + m - 1) // m) * m


# ----------------------- kernel 1: fused QKV projection -----------------------
def _qkv_proj_kernel(x_ref, w_ref, q_ref, k_ref, v_ref):
    # x_ref: (1, tproj, d_in_p) bf16
    # w_ref: (3, d_in_p, d_p)   bf16  -> [Wq * 1/sqrt(d_out) | Wk | Wv] stacked on
    #                                    the leading (non-lane) axis
    # q/k/v: (1, tproj, d_p)    bf16  (lane-dense, 128-aligned)
    x = x_ref[0]
    q_ref[0] = jnp.dot(x, w_ref[0], preferred_element_type=jnp.float32).astype(q_ref.dtype)
    k_ref[0] = jnp.dot(x, w_ref[1], preferred_element_type=jnp.float32).astype(k_ref.dtype)
    v_ref[0] = jnp.dot(x, w_ref[2], preferred_element_type=jnp.float32).astype(v_ref.dtype)


# ------------------ kernel 2: flash-style attention (online softmax) ----------
def _flash_attn_kernel(q_ref, k_ref, v_ref, o_ref, m_sc, l_sc, acc_sc,
                       *, seq_len, padded_len):
    kv = pl.program_id(2)

    @pl.when(kv == 0)
    def _():
        m_sc[...] = jnp.full(m_sc.shape, -jnp.inf, dtype=m_sc.dtype)
        l_sc[...] = jnp.zeros(l_sc.shape, dtype=l_sc.dtype)
        acc_sc[...] = jnp.zeros(acc_sc.shape, dtype=acc_sc.dtype)

    q = q_ref[0]                  # (tq, d_p) bf16, pre-scaled by 1/sqrt(d_out)
    k = k_ref[0]                  # (tk, d_p) bf16
    tk = k.shape[0]

    # s = q @ k.T : contract the lane axes directly; f32 accumulation on the MXU.
    s = lax.dot_general(q, k, (((1,), (1,)), ((), ())),
                        preferred_element_type=jnp.float32)        # (tq, tk) f32

    if seq_len != padded_len:     # static: mask zero-padded key rows
        key_idx = kv * tk + lax.broadcasted_iota(jnp.int32, s.shape, 1)
        s = jnp.where(key_idx < seq_len, s, -1e30)

    m_prev = m_sc[0]                                             # (tq, 1)
    m_new = jnp.maximum(m_prev, jnp.max(s, axis=-1, keepdims=True))
    alpha = jnp.exp(m_prev - m_new)
    p = jnp.exp(s - m_new)                                       # (tq, tk) f32
    l_sc[0] = alpha * l_sc[0] + jnp.sum(p, axis=-1, keepdims=True)
    acc_sc[0] = alpha * acc_sc[0] + jnp.dot(
        p.astype(v_ref.dtype), v_ref[0], preferred_element_type=jnp.float32)
    m_sc[0] = m_new

    @pl.when(kv == pl.num_programs(2) - 1)
    def _():
        # Exact divide (VALU has slack here) so softmax rows sum to 1.
        o_ref[0] = (acc_sc[0] / l_sc[0]).astype(o_ref.dtype)


# ------------------------------- host wrappers --------------------------------
def prepare_qkv_weights(w_query, w_key, w_value):
    """Fuse + pad the projection weights once (static; hoisted out of hot path)."""
    d_in, d_out = w_query.shape
    d_in_p = _round_up(d_in, LANE)
    d_p = _round_up(d_out, LANE)
    scale = 1.0 / float(d_out) ** 0.5      # softmax scale folded into W_query
    w = jnp.stack([w_query.astype(jnp.float32) * scale,
                   w_key.astype(jnp.float32),
                   w_value.astype(jnp.float32)], axis=0)          # (3, d_in, d_out)
    w = jnp.pad(w, ((0, 0), (0, d_in_p - d_in), (0, d_p - d_out)))
    return w.astype(jnp.bfloat16)


def _pick_tiles(T):
    # Conservative tile sizes that fit v7x's 64 MiB VMEM with headroom.
    if T <= 512:
        t_pad = _round_up(T, 16)
        return t_pad, t_pad, t_pad
    t_pad = _round_up(T, 256)
    return t_pad, 256, 256


def self_attention_fwd(inputs, wqkv_p, d_out):
    """Hot path. inputs: (T, d_in) or (B, T, d_in); wqkv_p from prepare_qkv_weights."""
    squeeze = inputs.ndim == 2
    x = inputs[None] if squeeze else inputs                       # (B, T, d_in)
    B, T, d_in = x.shape
    _, d_in_p, d_p = wqkv_p.shape
    t_pad, tq, tk = _pick_tiles(T)

    x_p = jnp.pad(x.astype(jnp.bfloat16),
                  ((0, 0), (0, t_pad - T), (0, d_in_p - d_in)))

    # ---- kernel 1: QKV projection, grid (batch, seq tiles) -------------------
    qkv_shape = jax.ShapeDtypeStruct((B, t_pad, d_p), jnp.bfloat16)
    q, k, v = pl.pallas_call(
        _qkv_proj_kernel,
        out_shape=(qkv_shape, qkv_shape, qkv_shape),
        grid=(B, t_pad // tq),
        in_specs=[
            pl.BlockSpec((1, tq, d_in_p), lambda b, t: (b, t, 0)),
            pl.BlockSpec((3, d_in_p, d_p), lambda b, t: (0, 0, 0)),  # resident weight
        ],
        out_specs=(
            pl.BlockSpec((1, tq, d_p), lambda b, t: (b, t, 0)),
            pl.BlockSpec((1, tq, d_p), lambda b, t: (b, t, 0)),
            pl.BlockSpec((1, tq, d_p), lambda b, t: (b, t, 0)),
        ),
        compiler_params=pltpu.CompilerParams(
            dimension_semantics=("parallel", "parallel")),
    )(x_p, wqkv_p)

    # ---- kernel 2: flash attention, grid (batch, q tiles, kv tiles) ----------
    kernel = functools.partial(_flash_attn_kernel, seq_len=T, padded_len=t_pad)
    out_p = pl.pallas_call(
        kernel,
        out_shape=jax.ShapeDtypeStruct((B, t_pad, d_p), jnp.float32),
        grid=(B, t_pad // tq, t_pad // tk),
        in_specs=[
            pl.BlockSpec((1, tq, d_p), lambda b, i, j: (b, i, 0)),
            pl.BlockSpec((1, tk, d_p), lambda b, i, j: (b, j, 0)),
            pl.BlockSpec((1, tk, d_p), lambda b, i, j: (b, j, 0)),
        ],
        out_specs=pl.BlockSpec((1, tq, d_p), lambda b, i, j: (b, i, 0)),
        scratch_shapes=[
            pltpu.VMEM((1, tq, 1), jnp.float32),     # running max m
            pltpu.VMEM((1, tq, 1), jnp.float32),     # running sum l
            pltpu.VMEM((1, tq, d_p), jnp.float32),   # accumulator
        ],
        compiler_params=pltpu.CompilerParams(
            dimension_semantics=("parallel", "parallel", "arbitrary")),
    )(q, k, v)

    out = out_p[:, :T, :d_out]
    return out[0] if squeeze else out


def self_attention_v1(inputs, w_query, w_key, w_value):
    """Drop-in equivalent of SelfAttentionV1.forward (weights fused per call)."""
    d_out = w_query.shape[1]
    wqkv_p = prepare_qkv_weights(w_query, w_key, w_value)
    return self_attention_fwd(inputs, wqkv_p, d_out)


# ------------------------------ pure-JAX reference -----------------------------
def _reference(inputs, w_query, w_key, w_value):
    keys = inputs @ w_key
    values = inputs @ w_value
    queries = inputs @ w_query
    scores = queries @ keys.T
    weights = jax.nn.softmax(scores / (keys.shape[-1] ** 0.5), axis=-1)
    return weights @ values


# ----------------------------------- main ---------------------------------------
if __name__ == "__main__":
    key = jax.random.PRNGKey(0)
    k_in, k_q, k_k, k_v, k_b = jax.random.split(key, 5)

    T, d_in, d_out = 8, 32, 32   # small shapes consistent with the module

    inputs = 0.25 * jax.random.normal(k_in, (T, d_in), dtype=jnp.float32)
    # torch.rand -> uniform [0, 1)
    w_query = jax.random.uniform(k_q, (d_in, d_out), dtype=jnp.float32)
    w_key = jax.random.uniform(k_k, (d_in, d_out), dtype=jnp.float32)
    w_value = jax.random.uniform(k_v, (d_in, d_out), dtype=jnp.float32)

    # --- single-sequence path (exactly the PyTorch module's forward) ----------
    ctx = jax.block_until_ready(self_attention_v1(inputs, w_query, w_key, w_value))
    ref = _reference(inputs, w_query, w_key, w_value)
    assert ctx.shape == (T, d_out)
    assert bool(jnp.all(jnp.isfinite(ctx)))
    # bf16 MXU operands (f32 accumulation) -> small deviation from f32 reference
    assert bool(jnp.allclose(ctx, ref, rtol=2e-2, atol=2e-2))

    # --- batched path: weights prepared once, B sequences per pallas_call -----
    B = 3
    xb = 0.25 * jax.random.normal(k_b, (B, T, d_in), dtype=jnp.float32)
    wqkv_p = prepare_qkv_weights(w_query, w_key, w_value)
    ctx_b = jax.block_until_ready(self_attention_fwd(xb, wqkv_p, d_out))
    ref_b = jax.vmap(lambda x: _reference(x, w_query, w_key, w_value))(xb)
    assert ctx_b.shape == (B, T, d_out)
    assert bool(jnp.all(jnp.isfinite(ctx_b)))
    assert bool(jnp.allclose(ctx_b, ref_b, rtol=2e-2, atol=2e-2))

    print("KERNEL_OK")
</pallas_src>

<mosaic_0001>
module attributes {stable_mosaic.version = 11 : i64} {
  func.func @_qkv_proj_kernel(%arg0: i32, %arg1: i32, %arg2: memref<1x16x128xbf16, #tpu.memory_space<vmem>>, %arg3: memref<3x128x128xbf16, #tpu.memory_space<vmem>>, %arg4: memref<1x16x128xbf16, #tpu.memory_space<vmem>>, %arg5: memref<1x16x128xbf16, #tpu.memory_space<vmem>>, %arg6: memref<1x16x128xbf16, #tpu.memory_space<vmem>>) attributes {dimension_semantics = [#tpu.dimension_semantics<parallel>, #tpu.dimension_semantics<parallel>], iteration_bounds = array<i64: 1, 1>, scalar_prefetch = 0 : i64, scratch_operands = 0 : i64, tpu.core_type = #tpu.core_type<tc>, window_params = [{transform_indices = @transform_0, window_bounds = array<i64: 1, 16, 128>}, {pipeline_mode = #tpu.pipeline_mode<synchronous>, transform_indices = @transform_1, window_bounds = array<i64: 3, 128, 128>}, {transform_indices = @transform_2, window_bounds = array<i64: 1, 16, 128>}, {transform_indices = @transform_3, window_bounds = array<i64: 1, 16, 128>}, {transform_indices = @transform_4, window_bounds = array<i64: 1, 16, 128>}]} {
    %c0 = arith.constant 0 : index
    %c0_0 = arith.constant 0 : index
    %c0_1 = arith.constant 0 : index
    %0 = vector.load %arg2[%c0, %c0_0, %c0_1] : memref<1x16x128xbf16, #tpu.memory_space<vmem>>, vector<1x16x128xbf16>
    %1 = vector.shape_cast %0 : vector<1x16x128xbf16> to vector<16x128xbf16>
    %c0_2 = arith.constant 0 : index
    %c0_3 = arith.constant 0 : index
    %c0_4 = arith.constant 0 : index
    %2 = vector.load %arg3[%c0_2, %c0_3, %c0_4] : memref<3x128x128xbf16, #tpu.memory_space<vmem>>, vector<1x128x128xbf16>
    %3 = vector.shape_cast %2 : vector<1x128x128xbf16> to vector<128x128xbf16>
    %cst = arith.constant dense<0.000000e+00> : vector<16x128xf32>
    %4 = tpu.matmul %1, %3, %cst {dimension_numbers = #tpu.dot_dimension_numbers<[1], [0], [0], [1], [0, 0, 1, 1], [], []>} : vector<16x128xbf16>, vector<128x128xbf16>, vector<16x128xf32> -> vector<16x128xf32>
    %5 = arith.truncf %4 : vector<16x128xf32> to vector<16x128xbf16>
    %c0_5 = arith.constant 0 : index
    %c0_6 = arith.constant 0 : index
    %c0_7 = arith.constant 0 : index
    %6 = vector.load %arg4[%c0_5, %c0_6, %c0_7] : memref<1x16x128xbf16, #tpu.memory_space<vmem>>, vector<1x16x128xbf16>
    %7 = vector.shape_cast %6 : vector<1x16x128xbf16> to vector<16x128xbf16>
    %8 = vector.shape_cast %5 : vector<16x128xbf16> to vector<1x16x128xbf16>
    tpu.vector_store %arg4[%c0_5, %c0_6, %c0_7], %8 {strides = array<i32>} : memref<1x16x128xbf16, #tpu.memory_space<vmem>>, vector<1x16x128xbf16>,
    %c1 = arith.constant 1 : index
    %c0_8 = arith.constant 0 : index
    %c0_9 = arith.constant 0 : index
    %9 = vector.load %arg3[%c1, %c0_8, %c0_9] : memref<3x128x128xbf16, #tpu.memory_space<vmem>>, vector<1x128x128xbf16>
    %10 = vector.shape_cast %9 : vector<1x128x128xbf16> to vector<128x128xbf16>
    %cst_10 = arith.constant dense<0.000000e+00> : vector<16x128xf32>
    %11 = tpu.matmul %1, %10, %cst_10 {dimension_numbers = #tpu.dot_dimension_numbers<[1], [0], [0], [1], [0, 0, 1, 1], [], []>} : vector<16x128xbf16>, vector<128x128xbf16>, vector<16x128xf32> -> vector<16x128xf32>
    %12 = arith.truncf %11 : vector<16x128xf32> to vector<16x128xbf16>
    %c0_11 = arith.constant 0 : index
    %c0_12 = arith.constant 0 : index
    %c0_13 = arith.constant 0 : index
    %13 = vector.load %arg5[%c0_11, %c0_12, %c0_13] : memref<1x16x128xbf16, #tpu.memory_space<vmem>>, vector<1x16x128xbf16>
    %14 = vector.shape_cast %13 : vector<1x16x128xbf16> to vector<16x128xbf16>
    %15 = vector.shape_cast %12 : vector<16x128xbf16> to vector<1x16x128xbf16>
    tpu.vector_store %arg5[%c0_11, %c0_12, %c0_13], %15 {strides = array<i32>} : memref<1x16x128xbf16, #tpu.memory_space<vmem>>, vector<1x16x128xbf16>,
    %c2 = arith.constant 2 : index
    %c0_14 = arith.constant 0 : index
    %c0_15 = arith.constant 0 : index
    %16 = vector.load %arg3[%c2, %c0_14, %c0_15] : memref<3x128x128xbf16, #tpu.memory_space<vmem>>, vector<1x128x128xbf16>
    %17 = vector.shape_cast %16 : vector<1x128x128xbf16> to vector<128x128xbf16>
    %cst_16 = arith.constant dense<0.000000e+00> : vector<16x128xf32>
    %18 = tpu.matmul %1, %17, %cst_16 {dimension_numbers = #tpu.dot_dimension_numbers<[1], [0], [0], [1], [0, 0, 1, 1], [], []>} : vector<16x128xbf16>, vector<128x128xbf16>, vector<16x128xf32> -> vector<16x128xf32>
    %19 = arith.truncf %18 : vector<16x128xf32> to vector<16x128xbf16>
    %c0_17 = arith.constant 0 : index
    %c0_18 = arith.constant 0 : index
    %c0_19 = arith.constant 0 : index
    %20 = vector.load %arg6[%c0_17, %c0_18, %c0_19] : memref<1x16x128xbf16, #tpu.memory_space<vmem>>, vector<1x16x128xbf16>
    %21 = vector.shape_cast %20 : vector<1x16x128xbf16> to vector<16x128xbf16>
    %22 = vector.shape_cast %19 : vector<16x128xbf16> to vector<1x16x128xbf16>
    tpu.vector_store %arg6[%c0_17, %c0_18, %c0_19], %22 {strides = array<i32>} : memref<1x16x128xbf16, #tpu.memory_space<vmem>>, vector<1x16x128xbf16>,
    return
  }
  func.func @transform_0(%arg0: i32, %arg1: i32) -> (i32, i32, i32) {
    %c0_i32 = arith.constant 0 : i32
    %c0_i32_0 = arith.constant 0 : i32
    return %arg0, %arg1, %c0_i32 : i32, i32, i32
  }
  func.func @transform_1(%arg0: i32, %arg1: i32) -> (i32, i32, i32) {
    %c0_i32 = arith.constant 0 : i32
    %c0_i32_0 = arith.constant 0 : i32
    %c0_i32_1 = arith.constant 0 : i32
    %c0_i32_2 = arith.constant 0 : i32
    return %c0_i32, %c0_i32_0, %c0_i32_1 : i32, i32, i32
  }
  func.func @transform_2(%arg0: i32, %arg1: i32) -> (i32, i32, i32) {
    %c0_i32 = arith.constant 0 : i32
    %c0_i32_0 = arith.constant 0 : i32
    return %arg0, %arg1, %c0_i32 : i32, i32, i32
  }
  func.func @transform_3(%arg0: i32, %arg1: i32) -> (i32, i32, i32) {
    %c0_i32 = arith.constant 0 : i32
    %c0_i32_0 = arith.constant 0 : i32
    return %arg0, %arg1, %c0_i32 : i32, i32, i32
  }
  func.func @transform_4(%arg0: i32, %arg1: i32) -> (i32, i32, i32) {
    %c0_i32 = arith.constant 0 : i32
    %c0_i32_0 = arith.constant 0 : i32
    return %arg0, %arg1, %c0_i32 : i32, i32, i32
  }
}

</mosaic_0001>

<bundles_post_ra>
// kernel: tpu_custom_call.1
= control target key start
LH: loop header
LB: loop body
LE: loop exit
PB: predicated region body
PF: predicated region fallthrough
CT: control target
= control target key end

     0   :  { %10 = vsyncpa [#allocation3], 0  ;;  %s879_s0 = inlined_call_operand.hbm [shape: bf16[1,16,128], index: 0, kind: input, shape index: {}]   ;;  %s880_s1 = inlined_call_operand.hbm [shape: bf16[3,128,128], index: 1, kind: input, shape index: {}]   ;;  %s881_s2 = inlined_call_operand.hbm [shape: bf16[1,16,128], index: 2, kind: output, shape index: {0}]   ;;  %s882_s3 = inlined_call_operand.hbm [shape: bf16[1,16,128], index: 3, kind: output, shape index: {1}]   ;;  %s883_s4 = inlined_call_operand.hbm [shape: bf16[1,16,128], index: 4, kind: output, shape index: {2}]  }
   0x1   :  { %11 = vsyncpa [#allocation6], 0 }
   0x2   :  { %12 = vsyncpa [#allocation4], 0 }
   0x3   :  { %13 = vsyncpa [#allocation9], 0  ;;  %s740_s15 = smov [#allocation2]   ;;  %s622_s19 = scalar_lea.hbm %s879_s0, 128 }
   0x4   :  { %s19_s16 = sshll.u32 %s740_s15, 4  ;;  %p623_p0 = scmp.ne.s32.totalorder %s879_s0, %s622_s19  ;;  %s20_s16 = int_to_ptr.vmem [resolvable:$true] %s19_s16 }
   0x5   :  { %p626_p1 = scmp.lt.u32.totalorder %s622_s19, %s879_s0 }
   0x7   :  { %p628_p2 = pnand %p626_p1, %p623_p0 }
   0x9   :  { %631 = shalt.err (!%p628_p2)
}
   0xa   :  { %s632_s24 = scalar_lea.vmem %s20_s16, 128  ;;  %p637_p4 = scmp.lt.s32.totalorder %s20_s16, %s20_s16 }
   0xb   :  { %p633_p3 = scmp.ne.s32.totalorder %s20_s16, %s632_s24  ;;  %p638_p5 = scmp.lt.s32.totalorder %s632_s24, %s632_s24 }
   0xd   :  { %p639_p6 = por %p638_p5, %p637_p4 }
   0xf   :  { %p640_p7 = pnand %p639_p6, %p633_p3 }
  0x11   :  { %643 = shalt.err (!%p640_p7)
}
  0x12   :  { %s741_s25 = smov 64   ;;  %s742_s26 = smov 4  }
  0x13   :  { %25 = dma.hbm_to_vmem [thread:$0]  %s879_s0, 128, %s20_s16, [#allocation3], %s741_s25, %s741_s25, %s742_s26  }
  0x14   :  { %s743_s29 = smov [#allocation5]   ;;  %s644_s7 = scalar_lea.hbm %s880_s1, 3072 }
  0x15   :  { %s31_s30 = sshll.u32 %s743_s29, 4  ;;  %p645_p8 = scmp.ne.s32.totalorder %s880_s1, %s644_s7  ;;  %s32_s30 = int_to_ptr.vmem [resolvable:$true] %s31_s30 }
  0x16   :  { %p648_p9 = scmp.lt.u32.totalorder %s644_s7, %s880_s1 }
  0x18   :  { %p650_p10 = pnand %p648_p9, %p645_p8 }
  0x1a   :  { %653 = shalt.err (!%p650_p10)
}
  0x1b   :  { %s654_s12 = scalar_lea.vmem %s32_s30, 3072  ;;  %p659_p12 = scmp.lt.s32.totalorder %s32_s30, %s32_s30 }
  0x1c   :  { %p655_p11 = scmp.ne.s32.totalorder %s32_s30, %s654_s12  ;;  %p660_p13 = scmp.lt.s32.totalorder %s654_s12, %s654_s12 }
  0x1e   :  { %p661_p0 = por %p660_p13, %p659_p12 }
  0x20   :  { %p662_p1 = pnand %p661_p0, %p655_p11 }
  0x22   :  { %665 = shalt.err (!%p662_p1)
}
  0x23   :  { %37 = dma.hbm_to_vmem [thread:$0]  %s880_s1, 3072, %s32_s30, [#allocation6], %s741_s25, %s741_s25, %s742_s26  }
  0x24   :  { %732 = dma.done.wait [#allocation3], 128  }
  0x25   :  { %733 = vsyncadd [#allocation3], 4294967168 }
  0x26   :  { %734 = dma.done.wait [#allocation6], 3072  }
  0x27   :  { %735 = vsyncadd [#allocation6], 4294964224  ;;  %v744_v0 = vmov 0.0   ;;  %vm745_vm0 = vmmov 0   ;;  %v597_v1 = vld [vmem:[#allocation5] sm:$0xff]   ;;  %v598_v2 = vld [vmem:[#allocation5 + $0x8] sm:$0xff]  }
  0x28   :  { %528 = vmatprep.subr.bf16.mxu0 %v744_v0  ;;  %548 = vmatprep.subr.bf16.mxu1 %v744_v0  ;;  %v599_v3 = vld [vmem:[#allocation5 + $0x10] sm:$0xff]   ;;  %v605_v4 = vld [vmem:[#allocation5 + $0x40] sm:$0xff]   ;;  %v600_v5 = vld [vmem:[#allocation5 + $0x18] sm:$0xff]   ;;  %s746_s1 = smov [#allocation7]  }
  0x29   :  { %544 = vmatprep.mubr.msk.bf16.mxu0 %vm745_vm0, %v744_v0  ;;  %564 = vmatprep.mubr.msk.bf16.mxu1 %vm745_vm0, %v744_v0  ;;  %v607_v6 = vld [vmem:[#allocation5 + $0x48] sm:$0xff]   ;;  %v601_v7 = vld [vmem:[#allocation5 + $0x20] sm:$0xff]   ;;  %v609_v8 = vld [vmem:[#allocation5 + $0x50] sm:$0xff]   ;;  %s405_s14 = sshll.u32 %s746_s1, 4  ;;  %s406_s14 = int_to_ptr.vmem [resolvable:$true] %s405_s14 }
  0x2a   :  { %529 = vmatpush3.bf16.msra.mxu0 %v597_v1  ;;  %549 = vmatpush3.bf16.msra.mxu1 %v605_v4  ;;  %v602_v9 = vld [vmem:[#allocation5 + $0x28] sm:$0xff]   ;;  %v611_v10 = vld [vmem:[#allocation5 + $0x58] sm:$0xff]   ;;  %v603_v11 = vld [vmem:[#allocation5 + $0x30] sm:$0xff]   ;;  %s666_s15 = scalar_lea.vmem %s406_s14, 128  ;;  %p671_p3 = scmp.lt.s32.totalorder %s406_s14, %s406_s14 }
  0x2b   :  { %530 = vmatprep.subr.bf16.mxu0 %v744_v0  ;;  %550 = vmatprep.subr.bf16.mxu1 %v744_v0  ;;  %v613_v12 = vld [vmem:[#allocation5 + $0x60] sm:$0xff]   ;;  %v604_v13 = vld [vmem:[#allocation5 + $0x38] sm:$0xff]   ;;  %v615_v14 = vld [vmem:[#allocation5 + $0x68] sm:$0xff]   ;;  %p667_p2 = scmp.ne.s32.totalorder %s406_s14, %s666_s15  ;;  %p672_p4 = scmp.lt.s32.totalorder %s666_s15, %s666_s15 }
  0x2c   :  { %v606_v15 = vld [vmem:[#allocation2] sm:$0xff]   ;;  %v608_v16 = vld [vmem:[#allocation5 + $0x80] sm:$0xff]   ;;  %v617_v17 = vld [vmem:[#allocation5 + $0x70] sm:$0xff]  }
  0x2d   :  { %v610_v18 = vld [vmem:[#allocation5 + $0x88] sm:$0xff]   ;;  %v619_v19 = vld [vmem:[#allocation5 + $0x78] sm:$0xff]   ;;  %v612_v20 = vld [vmem:[#allocation5 + $0x90] sm:$0xff]   ;;  %p673_p5 = por %p672_p4, %p671_p3 }
  0x2e   :  { %531 = vmatpush3.bf16.msra.mxu0 %v598_v2  ;;  %551 = vmatpush3.bf16.msra.mxu1 %v607_v6  ;;  %v614_v21 = vld [vmem:[#allocation5 + $0x98] sm:$0xff]   ;;  %v616_v22 = vld [vmem:[#allocation5 + $0xa0] sm:$0xff]   ;;  %v618_v23 = vld [vmem:[#allocation5 + $0xa8] sm:$0xff]  }
  0x2f   :  { %532 = vmatprep.subr.bf16.mxu0 %v744_v0  ;;  %552 = vmatprep.subr.bf16.mxu1 %v744_v0  ;;  %v620_v24 = vld [vmem:[#allocation5 + $0xb0] sm:$0xff]   ;;  %v621_v25 = vld [vmem:[#allocation5 + $0xb8] sm:$0xff]   ;;  %p674_p6 = pnand %p673_p5, %p667_p2 }
  0x32   :  { %533 = vmatpush3.bf16.msra.mxu0 %v599_v3  ;;  %553 = vmatpush3.bf16.msra.mxu1 %v609_v8 }
  0x33   :  { %534 = vmatprep.subr.bf16.mxu0 %v744_v0  ;;  %554 = vmatprep.subr.bf16.mxu1 %v744_v0 }
  0x36   :  { %535 = vmatpush3.bf16.msra.mxu0 %v600_v5  ;;  %555 = vmatpush3.bf16.msra.mxu1 %v611_v10 }
  0x37   :  { %536 = vmatprep.subr.bf16.mxu0 %v744_v0  ;;  %556 = vmatprep.subr.bf16.mxu1 %v744_v0 }
  0x3a   :  { %537 = vmatpush3.bf16.msra.mxu0 %v601_v7  ;;  %557 = vmatpush3.bf16.msra.mxu1 %v613_v12 }
  0x3b   :  { %538 = vmatprep.subr.bf16.mxu0 %v744_v0  ;;  %558 = vmatprep.subr.bf16.mxu1 %v744_v0 }
  0x3e   :  { %539 = vmatpush3.bf16.msra.mxu0 %v602_v9  ;;  %559 = vmatpush3.bf16.msra.mxu1 %v615_v14 }
  0x3f   :  { %540 = vmatprep.subr.bf16.mxu0 %v744_v0  ;;  %560 = vmatprep.subr.bf16.mxu1 %v744_v0 }
  0x42   :  { %541 = vmatpush3.bf16.msra.mxu0 %v603_v11  ;;  %561 = vmatpush3.bf16.msra.mxu1 %v617_v17 }
  0x43   :  { %542 = vmatprep.subr.bf16.mxu0 %v744_v0  ;;  %562 = vmatprep.subr.bf16.mxu1 %v744_v0 }
  0x46   :  { %543 = vmatpush3.bf16.msra.mxu0 %v604_v13  ;;  %563 = vmatpush3.bf16.msra.mxu1 %v619_v19 }
  0x47   :  { %568 = vmatprep.subr.bf16.mxu0 %v744_v0 }
  0x49   :  { %545 = vmatmul.mubr.bf16.vlgmr.msra.gmra.mrb[0].mxu0 %v606_v15  ;;  %565 = vmatmul.mubr.bf16.vlgmr.msra.gmra.mrb[0].mxu1 %v606_v15 }
  0x4a   :  { %569 = vmatpush3.bf16.msra.mxu0 %v608_v16  ;;  %584 = vmatprep.mubr.msk.bf16.mxu0 %vm745_vm0, %v744_v0 }
  0x4b   :  { %570 = vmatprep.subr.bf16.mxu0 %v744_v0 }
  0x4e   :  { %571 = vmatpush3.bf16.msra.mxu0 %v610_v18 }
  0x4f   :  { %572 = vmatprep.subr.bf16.mxu0 %v744_v0 }
  0x52   :  { %573 = vmatpush3.bf16.msra.mxu0 %v612_v20 }
  0x53   :  { %574 = vmatprep.subr.bf16.mxu0 %v744_v0 }
  0x56   :  { %575 = vmatpush3.bf16.msra.mxu0 %v614_v21 }
  0x57   :  { %576 = vmatprep.subr.bf16.mxu0 %v744_v0 }
  0x5a   :  { %577 = vmatpush3.bf16.msra.mxu0 %v616_v22 }
  0x5b   :  { %578 = vmatprep.subr.bf16.mxu0 %v744_v0 }
  0x5e   :  { %579 = vmatpush3.bf16.msra.mxu0 %v618_v23 }
  0x5f   :  { %580 = vmatprep.subr.bf16.mxu0 %v744_v0 }
  0x62   :  { %581 = vmatpush3.bf16.msra.mxu0 %v620_v24 }
  0x63   :  { %582 = vmatprep.subr.bf16.mxu0 %v744_v0 }
  0x66   :  { %583 = vmatpush3.bf16.msra.mxu0 %v621_v25 }
  0x69   :  { %585 = vmatmul.mubr.bf16.vlgmr.msra.gmra.mrb[4].mxu0 %v606_v15 }
 0x11c   :  { %v151_v26 = vpop.f32.mrb[0].mxu0 }
 0x11d   :  { %v546_v27 = vpop.f32.mrb[1].mxu0 }
 0x11e   :  { %v154_v28 = vpop.f32.mrb[2].mxu0 }
 0x11f   :  { %v489_v29 = vpack.c.bf16 %v154_v28, %v151_v26  ;;  %v547_v30 = vpop.f32.mrb[3].mxu0 }
 0x121   :  { %490 = vst [vmem:[#allocation7] sm:$0xff] %v489_v29  }
 0x122   :  { %677 = shalt.err (!%p674_p6)
}
 0x123   :  { %s678_s18 = scalar_lea.hbm %s881_s2, 128 }
 0x124   :  { %p679_p7 = scmp.ne.s32.totalorder %s881_s2, %s678_s18  ;;  %p682_p8 = scmp.lt.u32.totalorder %s678_s18, %s881_s2 }
 0x126   :  { %p684_p9 = pnand %p682_p8, %p679_p7 }
 0x128   :  { %687 = shalt.err (!%p684_p9)
}
 0x129   :  { %411 = dma.vmem_to_hbm [thread:$0]  %s406_s14, 128, %s881_s2, [#allocation4], %s741_s25, %s741_s25, %s742_s26   ;;  %v267_v31 = vpop.f32.mrb[0].mxu1 }
 0x12a   :  { %s747_s27 = smov [#allocation8]   ;;  %v566_v32 = vpop.f32.mrb[1].mxu1 }
 0x12b   :  { %s417_s28 = sshll.u32 %s747_s27, 4  ;;  %v270_v33 = vpop.f32.mrb[2].mxu1  ;;  %s418_s28 = int_to_ptr.vmem [resolvable:$true] %s417_s28 }
 0x12c   :  { %v494_v34 = vpack.c.bf16 %v270_v33, %v267_v31  ;;  %v567_v35 = vpop.f32.mrb[3].mxu1  ;;  %s688_s29 = scalar_lea.vmem %s418_s28, 128  ;;  %p693_p11 = scmp.lt.s32.totalorder %s418_s28, %s418_s28 }
 0x12d   :  { %p689_p10 = scmp.ne.s32.totalorder %s418_s28, %s688_s29  ;;  %p694_p12 = scmp.lt.s32.totalorder %s688_s29, %s688_s29 }
 0x12e   :  { %495 = vst [vmem:[#allocation8] sm:$0xff] %v494_v34  }
 0x12f   :  { %p695_p13 = por %p694_p12, %p693_p11 }
 0x131   :  { %p696_p0 = pnand %p695_p13, %p689_p10 }
 0x133   :  { %699 = shalt.err (!%p696_p0)
}
 0x134   :  { %s700_s2 = scalar_lea.hbm %s882_s3, 128 }
 0x135   :  { %p701_p1 = scmp.ne.s32.totalorder %s882_s3, %s700_s2  ;;  %p704_p2 = scmp.lt.u32.totalorder %s700_s2, %s882_s3 }
 0x137   :  { %p706_p3 = pnand %p704_p2, %p701_p1 }
 0x139   :  { %709 = shalt.err (!%p706_p3)
}
 0x13a   :  { %423 = dma.vmem_to_hbm [thread:$0]  %s418_s28, 128, %s882_s3, [#allocation9], %s741_s25, %s741_s25, %s742_s26  }
 0x13b   :  { %s748_s12 = smov [#allocation10]  }
 0x13c   :  { %v383_v36 = vpop.f32.mrb[4].mxu0  ;;  %s429_s0 = sshll.u32 %s748_s12, 4  ;;  %s430_s0 = int_to_ptr.vmem [resolvable:$true] %s429_s0 }
 0x13d   :  { %v586_v37 = vpop.f32.mrb[5].mxu0  ;;  %s710_s13 = scalar_lea.vmem %s430_s0, 128  ;;  %p715_p5 = scmp.lt.s32.totalorder %s430_s0, %s430_s0 }
 0x13e   :  { %v386_v38 = vpop.f32.mrb[6].mxu0  ;;  %p711_p4 = scmp.ne.s32.totalorder %s430_s0, %s710_s13  ;;  %p716_p6 = scmp.lt.s32.totalorder %s710_s13, %s710_s13 }
 0x13f   :  { %v499_v39 = vpack.c.bf16 %v386_v38, %v383_v36  ;;  %v587_v40 = vpop.f32.mrb[7].mxu0 }
 0x140   :  { %p717_p7 = por %p716_p6, %p715_p5 }
 0x141   :  { %500 = vst [vmem:[#allocation10] sm:$0xff] %v499_v39  }
 0x142   :  { %p718_p8 = pnand %p717_p7, %p711_p4 }
 0x144   :  { %721 = shalt.err (!%p718_p8)
}
 0x145   :  { %s722_s3 = scalar_lea.hbm %s883_s4, 128 }
 0x146   :  { %p723_p9 = scmp.ne.s32.totalorder %s883_s4, %s722_s3  ;;  %p726_p10 = scmp.lt.u32.totalorder %s722_s3, %s883_s4 }
 0x148   :  { %p728_p11 = pnand %p726_p10, %p723_p9 }
 0x14a   :  { %731 = shalt.err (!%p728_p11)
}
 0x14b   :  { %435 = dma.vmem_to_hbm [thread:$0]  %s430_s0, 128, %s883_s4, [#allocation9], %s741_s25, %s741_s25, %s742_s26  }
 0x14c   :  { %736 = dma.done.wait [#allocation4], 128  }
 0x14d   :  { %737 = vsyncadd [#allocation4], 4294967168 }
 0x14e   :  { %738 = dma.done.wait [#allocation9], 256  }
 0x14f   :  { %739 = vsyncadd [#allocation9], 4294967040 }
 0x150   :  { %445 = vsyncpa [#allocation3], 1 }
 0x151   :  { %446 = vsyncpa [#allocation6], 1 }
 0x152   :  { %447 = vsyncpa [#allocation4], 1 }
 0x153   :  { %448 = vsyncpa [#allocation9], 1 }

</bundles_post_ra>
